<compile_context>
chip_gen: v7x
topology: tpu7x:2x2x1
jax: 0.10.0
libtpu: 0.0.40
codegen_flags: <defaults>
</compile_context>

<pallas_src>
import math

import jax
import jax.numpy as jnp
from jax.experimental import pallas as pl
from jax.experimental.pallas import tpu as pltpu


def _round_up(x, m):
    return (x + m - 1) // m * m


def _vmem_budget_bytes():
    """Scoped-VMEM budget with per-generation headroom."""
    cap = 64 * 2**20                      # conservative fallback (v7x-sized)
    try:
        cap = int(pltpu.get_tpu_info().vmem_capacity_bytes)
    except Exception:                     # pragma: no cover - info unavailable
        pass
    headroom = 16 * 2**20 if cap <= 64 * 2**20 else 24 * 2**20
    return max(32 * 2**20, cap - headroom)


# ----------------------------------------------------------------------------
# Kernels
# ----------------------------------------------------------------------------
def _ffn_resident_kernel(x_ref, w1_ref, b1_ref, w2_ref, b2_ref, o_ref):
    # Weights fully VMEM-resident (constant block index): 1-D grid over token
    # tiles, no accumulator, no init/finalize.
    x = x_ref[...].astype(w1_ref.dtype)
    h = jnp.dot(x, w1_ref[...], preferred_element_type=jnp.float32)
    h = jnp.maximum(h + b1_ref[...], 0.0)
    out = jnp.dot(h.astype(w2_ref.dtype), w2_ref[...],
                  preferred_element_type=jnp.float32)
    o_ref[...] = (out + b2_ref[...]).astype(o_ref.dtype)


def _ffn_streamed_kernel(x_ref, w1_ref, b1_ref, w2_ref, b2_ref, o_ref, acc_ref):
    # d_ff is a reduction grid axis (last): stream (d_model_p, tile_ff) /
    # (tile_ff, d_model_p) weight slabs and accumulate fc2 partials in f32.
    k = pl.program_id(1)

    @pl.when(k == 0)
    def _init():
        acc_ref[...] = jnp.zeros_like(acc_ref)

    x = x_ref[...].astype(w1_ref.dtype)
    h = jnp.dot(x, w1_ref[...], preferred_element_type=jnp.float32)
    h = jnp.maximum(h + b1_ref[...], 0.0)
    acc_ref[...] += jnp.dot(h.astype(w2_ref.dtype), w2_ref[...],
                            preferred_element_type=jnp.float32)

    @pl.when(k == pl.num_programs(1) - 1)
    def _finalize():
        o_ref[...] = (acc_ref[...] + b2_ref[...]).astype(o_ref.dtype)


# ----------------------------------------------------------------------------
# Parameter preparation (call once at init — not in the per-call hot path)
# ----------------------------------------------------------------------------
def _pad_cast(a, shape, dtype):
    if tuple(a.shape) == tuple(shape) and a.dtype == jnp.dtype(dtype):
        return a
    out = jnp.zeros(shape, dtype)
    return out.at[tuple(slice(0, s) for s in a.shape)].set(a.astype(dtype))


def prepare_ffn_params(w1, b1, w2, b2, *, compute_dtype=jnp.bfloat16):
    """Pad weights to 128-multiples and cast to the MXU dtype, ONCE.

    w1: [d_model, d_ff] (transpose of PyTorch fc1.weight), b1: [d_ff]
    w2: [d_ff, d_model] (transpose of PyTorch fc2.weight), b2: [d_model]
    Use compute_dtype=jnp.float32 as an exact-precision escape hatch.
    """
    d_model, d_ff = w1.shape
    d_model_p = _round_up(d_model, 128)
    d_ff_p = _round_up(d_ff, 128)
    return {
        "w1": _pad_cast(w1, (d_model_p, d_ff_p), compute_dtype),
        "b1": _pad_cast(b1.reshape(1, -1), (1, d_ff_p), jnp.float32),
        "w2": _pad_cast(w2, (d_ff_p, d_model_p), compute_dtype),
        "b2": _pad_cast(b2.reshape(1, -1), (1, d_model_p), jnp.float32),
        "d_model": d_model,
        "d_ff": d_ff,
    }


# ----------------------------------------------------------------------------
# Forward pass
# ----------------------------------------------------------------------------
def ffn_apply(x, params, *, tile_m=None, tile_ff=None):
    """x: [..., d_model] -> [..., d_model] using prepared (padded) params."""
    d_model = params["d_model"]
    w1_p, b1_p, w2_p, b2_p = params["w1"], params["b1"], params["w2"], params["b2"]
    d_model_p, d_ff_p = w1_p.shape
    c_sz = jnp.dtype(w1_p.dtype).itemsize

    assert x.shape[-1] == d_model, "last dim of x must be d_model"
    lead_shape = x.shape[:-1]
    out_dtype = x.dtype
    o_sz = jnp.dtype(out_dtype).itemsize

    x2d = x.reshape(-1, d_model)
    n = x2d.shape[0]
    x_sz_est = max(jnp.dtype(x2d.dtype).itemsize, c_sz)

    budget = _vmem_budget_bytes()

    # ---- token tile ---------------------------------------------------------
    if tile_m is None:
        tm = 1024 if n >= 16384 else 512
        if n > 512:
            # Keep >= 2 token tiles so the 'parallel' axis can split across
            # v7x's two TensorCores.
            tm = min(tm, max(256, _round_up(-(-n // 2), 256)))
    else:
        tm = tile_m
    tm = max(8, min(_round_up(tm, 8), _round_up(n, 8)))

    def vmem_usage(tm_, ff_cols, resident):
        w_bytes = 2 * d_model_p * ff_cols * c_sz            # W1 + W2 slabs
        use = 2 * (tm_ * d_model_p * x_sz_est                # x tile (dbl buf)
                   + tm_ * d_model_p * o_sz                  # out tile
                   + w_bytes                                 # weight buffers
                   + ff_cols * 4 + d_model_p * 4)            # biases
        use += tm_ * ff_cols * (4 + c_sz)                    # fc1 intermediate
        if not resident:
            use += tm_ * d_model_p * 4                       # f32 acc scratch
        return use

    # Shrink the token tile if even a modest streamed slab would blow VMEM.
    while tm > 256 and vmem_usage(tm, min(512, d_ff_p), False) > budget:
        tm = max(256, _round_up(tm // 2, 8))
    tile_m = tm
    n_p = _round_up(n, tile_m)
    num_m_tiles = n_p // tile_m

    # ---- activation padding only when actually needed -----------------------
    x_pad_needed = (n != n_p) or (d_model != d_model_p)
    if x_pad_needed:
        x_in = jnp.zeros((n_p, d_model_p), w1_p.dtype)
        x_in = x_in.at[:n, :d_model].set(x2d.astype(w1_p.dtype))
    else:
        x_in = x2d            # kernel casts to the MXU dtype; no extra HBM pass
    x_sz = jnp.dtype(x_in.dtype).itemsize

    weight_bytes = (w1_p.size + w2_p.size) * c_sz
    bias_bytes = (b1_p.size + b2_p.size) * 4
    act_bytes = x_in.size * x_sz + n_p * d_model_p * o_sz
    flops = 2 * 2 * n_p * d_model_p * d_ff_p

    # ---- mode selection ------------------------------------------------------
    resident_ok = vmem_usage(tile_m, d_ff_p, True) <= budget
    use_resident = resident_ok and (tile_ff is None or tile_ff >= d_ff_p)

    if use_resident:
        grid_spec = pltpu.PrefetchScalarGridSpec(
            num_scalar_prefetch=0,
            grid=(num_m_tiles,),
            in_specs=[
                pl.BlockSpec((tile_m, d_model_p), lambda i: (i, 0)),     # x
                pl.BlockSpec((d_model_p, d_ff_p), lambda i: (0, 0)),     # W1
                pl.BlockSpec((1, d_ff_p), lambda i: (0, 0)),             # b1
                pl.BlockSpec((d_ff_p, d_model_p), lambda i: (0, 0)),     # W2
                pl.BlockSpec((1, d_model_p), lambda i: (0, 0)),          # b2
            ],
            out_specs=pl.BlockSpec((tile_m, d_model_p), lambda i: (i, 0)),
        )
        kernel = _ffn_resident_kernel
        dims = ("parallel",)
        bytes_accessed = act_bytes + weight_bytes + bias_bytes
    else:
        if tile_ff is None:
            for cand in (2048, 1024, 512, 256, 128):
                if (cand <= d_ff_p and d_ff_p % cand == 0
                        and vmem_usage(tile_m, cand, False) <= budget):
                    tile_ff = cand
                    break
            else:
                tile_ff = 128
        else:
            tile_ff = min(_round_up(tile_ff, 128), d_ff_p)
            while d_ff_p % tile_ff != 0:      # keep slabs dividing d_ff_p
                tile_ff -= 128
        num_ff_tiles = d_ff_p // tile_ff

        grid_spec = pltpu.PrefetchScalarGridSpec(
            num_scalar_prefetch=0,
            grid=(num_m_tiles, num_ff_tiles),            # reduction axis last
            in_specs=[
                pl.BlockSpec((tile_m, d_model_p), lambda i, k: (i, 0)),   # x
                pl.BlockSpec((d_model_p, tile_ff), lambda i, k: (0, k)),  # W1
                pl.BlockSpec((1, tile_ff), lambda i, k: (0, k)),          # b1
                pl.BlockSpec((tile_ff, d_model_p), lambda i, k: (k, 0)),  # W2
                pl.BlockSpec((1, d_model_p), lambda i, k: (0, 0)),        # b2
            ],
            out_specs=pl.BlockSpec((tile_m, d_model_p), lambda i, k: (i, 0)),
            scratch_shapes=[pltpu.VMEM((tile_m, d_model_p), jnp.float32)],
        )
        kernel = _ffn_streamed_kernel
        dims = ("parallel", "arbitrary")
        # Weights are re-streamed once per token tile in this mode.
        bytes_accessed = act_bytes + num_m_tiles * (weight_bytes + bias_bytes)
        # TODO(synk): if weight DMA stays exposed on v6e, add
        # pipeline_mode=pl.Buffered(3) to the W1/W2 BlockSpecs.

    cost = pl.CostEstimate(flops=int(flops), transcendentals=0,
                           bytes_accessed=int(bytes_accessed))

    out = pl.pallas_call(
        kernel,
        out_shape=jax.ShapeDtypeStruct((n_p, d_model_p), out_dtype),
        grid_spec=grid_spec,
        compiler_params=pltpu.CompilerParams(
            dimension_semantics=dims,
            vmem_limit_bytes=int(budget),
        ),
        cost_estimate=cost,
    )(x_in, w1_p, b1_p, w2_p, b2_p)

    if x_pad_needed:
        out = out[:n, :d_model]
    return out.reshape(*lead_shape, d_model)


def position_wise_feed_forward(x, w1, b1, w2, b2, *, compute_dtype=jnp.bfloat16,
                               tile_m=None, tile_ff=None):
    """One-shot convenience wrapper. For repeated calls, use
    prepare_ffn_params() once and ffn_apply() per call."""
    params = prepare_ffn_params(w1, b1, w2, b2, compute_dtype=compute_dtype)
    return ffn_apply(x, params, tile_m=tile_m, tile_ff=tile_ff)


def xavier_uniform(key, fan_in, fan_out, shape, dtype=jnp.float32):
    # Matches torch.nn.init.xavier_uniform_ with gain=1.
    a = math.sqrt(6.0 / (fan_in + fan_out))
    return jax.random.uniform(key, shape, dtype=dtype, minval=-a, maxval=a)


if __name__ == "__main__":
    d_model, d_ff = 32, 64
    batch, seq = 2, 8

    key = jax.random.PRNGKey(0)
    kx, k1, k2 = jax.random.split(key, 3)

    # PyTorch fc1.weight is (d_ff, d_model); we store its transpose, etc.
    w1 = xavier_uniform(k1, d_model, d_ff, (d_model, d_ff))
    b1 = jnp.zeros((d_ff,), jnp.float32)
    w2 = xavier_uniform(k2, d_ff, d_model, (d_ff, d_model))
    b2 = jnp.zeros((d_model,), jnp.float32)

    x = jax.random.normal(kx, (batch, seq, d_model), jnp.float32)

    # Prepare (pad + cast) the weights ONCE; reuse across calls.
    params = prepare_ffn_params(w1, b1, w2, b2, compute_dtype=jnp.bfloat16)

    # Resident-weight (1-D grid) path.
    y = jax.block_until_ready(ffn_apply(x, params))
    ref = jnp.maximum(x @ w1 + b1, 0.0) @ w2 + b2
    assert y.shape == x.shape
    assert jnp.allclose(y, ref, atol=5e-2, rtol=5e-2), "resident path mismatch"

    # Also exercise the streamed (2-D grid, f32 accumulator) path with a
    # hidden dim spanning more than one slab.
    d_ff2 = 256
    w1b = xavier_uniform(k1, d_model, d_ff2, (d_model, d_ff2))
    b1b = jnp.zeros((d_ff2,), jnp.float32)
    w2b = xavier_uniform(k2, d_ff2, d_model, (d_ff2, d_model))
    b2b = jnp.zeros((d_model,), jnp.float32)
    params2 = prepare_ffn_params(w1b, b1b, w2b, b2b)
    y2 = jax.block_until_ready(ffn_apply(x, params2, tile_ff=128))
    ref2 = jnp.maximum(x @ w1b + b1b, 0.0) @ w2b + b2b
    assert y2.shape == x.shape
    assert jnp.allclose(y2, ref2, atol=5e-2, rtol=5e-2), "streamed path mismatch"

    print("KERNEL_OK")
</pallas_src>

<mosaic_0001>
module attributes {stable_mosaic.version = 11 : i64} {
  func.func @_ffn_resident_kernel(%arg0: i32, %arg1: memref<16x128xbf16, #tpu.memory_space<vmem>>, %arg2: memref<128x128xbf16, #tpu.memory_space<vmem>>, %arg3: memref<1x128xf32, #tpu.memory_space<vmem>>, %arg4: memref<128x128xbf16, #tpu.memory_space<vmem>>, %arg5: memref<1x128xf32, #tpu.memory_space<vmem>>, %arg6: memref<16x128xf32, #tpu.memory_space<vmem>>) attributes {dimension_semantics = [#tpu.dimension_semantics<parallel>], iteration_bounds = array<i64: 1>, scalar_prefetch = 0 : i64, scratch_operands = 0 : i64, tpu.core_type = #tpu.core_type<tc>, window_params = [{transform_indices = @transform_0, window_bounds = array<i64: 16, 128>}, {pipeline_mode = #tpu.pipeline_mode<synchronous>, transform_indices = @transform_1, window_bounds = array<i64: 128, 128>}, {pipeline_mode = #tpu.pipeline_mode<synchronous>, transform_indices = @transform_2, window_bounds = array<i64: 1, 128>}, {pipeline_mode = #tpu.pipeline_mode<synchronous>, transform_indices = @transform_3, window_bounds = array<i64: 128, 128>}, {pipeline_mode = #tpu.pipeline_mode<synchronous>, transform_indices = @transform_4, window_bounds = array<i64: 1, 128>}, {transform_indices = @transform_5, window_bounds = array<i64: 16, 128>}]} {
    %c0 = arith.constant 0 : index
    %c0_0 = arith.constant 0 : index
    %0 = vector.load %arg1[%c0, %c0_0] : memref<16x128xbf16, #tpu.memory_space<vmem>>, vector<16x128xbf16>
    %c0_1 = arith.constant 0 : index
    %c0_2 = arith.constant 0 : index
    %1 = vector.load %arg2[%c0_1, %c0_2] : memref<128x128xbf16, #tpu.memory_space<vmem>>, vector<128x128xbf16>
    %cst = arith.constant dense<0.000000e+00> : vector<16x128xf32>
    %2 = tpu.matmul %0, %1, %cst {dimension_numbers = #tpu.dot_dimension_numbers<[1], [0], [0], [1], [0, 0, 1, 1], [], []>} : vector<16x128xbf16>, vector<128x128xbf16>, vector<16x128xf32> -> vector<16x128xf32>
    %c0_3 = arith.constant 0 : index
    %c0_4 = arith.constant 0 : index
    %3 = vector.load %arg3[%c0_3, %c0_4] : memref<1x128xf32, #tpu.memory_space<vmem>>, vector<1x128xf32>
    %4 = vector.broadcast %3 : vector<1x128xf32> to vector<16x128xf32>
    %5 = arith.addf %2, %4 : vector<16x128xf32>
    %cst_5 = arith.constant 0.000000e+00 : f32
    %6 = vector.broadcast %cst_5 : f32 to vector<16x128xf32>
    %7 = arith.maximumf %5, %6 : vector<16x128xf32>
    %8 = arith.truncf %7 : vector<16x128xf32> to vector<16x128xbf16>
    %c0_6 = arith.constant 0 : index
    %c0_7 = arith.constant 0 : index
    %9 = vector.load %arg4[%c0_6, %c0_7] : memref<128x128xbf16, #tpu.memory_space<vmem>>, vector<128x128xbf16>
    %cst_8 = arith.constant dense<0.000000e+00> : vector<16x128xf32>
    %10 = tpu.matmul %8, %9, %cst_8 {dimension_numbers = #tpu.dot_dimension_numbers<[1], [0], [0], [1], [0, 0, 1, 1], [], []>} : vector<16x128xbf16>, vector<128x128xbf16>, vector<16x128xf32> -> vector<16x128xf32>
    %c0_9 = arith.constant 0 : index
    %c0_10 = arith.constant 0 : index
    %11 = vector.load %arg5[%c0_9, %c0_10] : memref<1x128xf32, #tpu.memory_space<vmem>>, vector<1x128xf32>
    %12 = vector.broadcast %11 : vector<1x128xf32> to vector<16x128xf32>
    %13 = arith.addf %10, %12 : vector<16x128xf32>
    %c0_11 = arith.constant 0 : index
    %c0_12 = arith.constant 0 : index
    %14 = vector.load %arg6[%c0_11, %c0_12] : memref<16x128xf32, #tpu.memory_space<vmem>>, vector<16x128xf32>
    tpu.vector_store %arg6[%c0_11, %c0_12], %13 {strides = array<i32>} : memref<16x128xf32, #tpu.memory_space<vmem>>, vector<16x128xf32>,
    return
  }
  func.func @transform_0(%arg0: i32) -> (i32, i32) {
    %c0_i32 = arith.constant 0 : i32
    %c0_i32_0 = arith.constant 0 : i32
    return %arg0, %c0_i32 : i32, i32
  }
  func.func @transform_1(%arg0: i32) -> (i32, i32) {
    %c0_i32 = arith.constant 0 : i32
    %c0_i32_0 = arith.constant 0 : i32
    %c0_i32_1 = arith.constant 0 : i32
    return %c0_i32, %c0_i32_0 : i32, i32
  }
  func.func @transform_2(%arg0: i32) -> (i32, i32) {
    %c0_i32 = arith.constant 0 : i32
    %c0_i32_0 = arith.constant 0 : i32
    %c0_i32_1 = arith.constant 0 : i32
    return %c0_i32, %c0_i32_0 : i32, i32
  }
  func.func @transform_3(%arg0: i32) -> (i32, i32) {
    %c0_i32 = arith.constant 0 : i32
    %c0_i32_0 = arith.constant 0 : i32
    %c0_i32_1 = arith.constant 0 : i32
    return %c0_i32, %c0_i32_0 : i32, i32
  }
  func.func @transform_4(%arg0: i32) -> (i32, i32) {
    %c0_i32 = arith.constant 0 : i32
    %c0_i32_0 = arith.constant 0 : i32
    %c0_i32_1 = arith.constant 0 : i32
    return %c0_i32, %c0_i32_0 : i32, i32
  }
  func.func @transform_5(%arg0: i32) -> (i32, i32) {
    %c0_i32 = arith.constant 0 : i32
    %c0_i32_0 = arith.constant 0 : i32
    return %arg0, %c0_i32 : i32, i32
  }
}

</mosaic_0001>

<bundles_post_ra>
// kernel: tpu_custom_call.1
= control target key start
LH: loop header
LB: loop body
LE: loop exit
PB: predicated region body
PF: predicated region fallthrough
CT: control target
= control target key end

     0   :  { %10 = vsyncpa [#allocation3], 0  ;;  %s626_s0 = inlined_call_operand.hbm [shape: bf16[16,128], index: 0, kind: input, shape index: {}]   ;;  %s627_s1 = inlined_call_operand.hbm [shape: bf16[128,128], index: 1, kind: input, shape index: {}]   ;;  %s628_s2 = inlined_call_operand.vmem [shape: f32[1,128], index: 2, kind: input, shape index: {}]   ;;  %s629_s3 = inlined_call_operand.hbm [shape: bf16[128,128], index: 3, kind: input, shape index: {}]   ;;  %s630_s4 = inlined_call_operand.vmem [shape: f32[1,128], index: 4, kind: input, shape index: {}]   ;;  %s631_s5 = inlined_call_operand.hbm [shape: f32[16,128], index: 5, kind: output, shape index: {}]  }
   0x1   :  { %11 = vsyncpa [#allocation6], 0 }
   0x2   :  { %12 = vsyncpa [#allocation4], 0  ;;  %s516_s18 = smov [#allocation5]   ;;  %s517_s20 = smov [#allocation2]  }
   0x3   :  { %s30_s19 = sshll.u32 %s516_s18, 4  ;;  %s18_s21 = sshll.u32 %s517_s20, 4  ;;  %s31_s19 = int_to_ptr.vmem [resolvable:$true] %s30_s19  ;;  %s556_s21 = int_to_ptr.vmem [resolvable:$true] %s18_s21 }
   0x4   :  { %s422_s24 = scalar_lea.hbm %s627_s1, 1024 }
   0x5   :  { %p423_p0 = scmp.ne.s32.totalorder %s627_s1, %s422_s24  ;;  %p426_p1 = scmp.lt.u32.totalorder %s422_s24, %s627_s1 }
   0x7   :  { %p428_p2 = pnand %p426_p1, %p423_p0 }
   0x9   :  { %431 = shalt.err (!%p428_p2)
}
   0xa   :  { %s432_s29 = scalar_lea.vmem %s31_s19, 1024  ;;  %p437_p4 = scmp.lt.s32.totalorder %s31_s19, %s31_s19 }
   0xb   :  { %p433_p3 = scmp.ne.s32.totalorder %s31_s19, %s432_s29  ;;  %p438_p5 = scmp.lt.s32.totalorder %s432_s29, %s432_s29 }
   0xd   :  { %p439_p6 = por %p438_p5, %p437_p4 }
   0xf   :  { %p440_p7 = pnand %p439_p6, %p433_p3 }
  0x11   :  { %443 = shalt.err (!%p440_p7)
}
  0x12   :  { %s518_s30 = smov 64   ;;  %s519_s6 = smov 4  }
  0x13   :  { %36 = dma.hbm_to_vmem [thread:$0]  %s627_s1, 1024, %s31_s19, [#allocation6], %s518_s30, %s518_s30, %s519_s6  }
  0x14   :  { %s444_s11 = scalar_lea.hbm %s626_s0, 128 }
  0x15   :  { %p445_p8 = scmp.ne.s32.totalorder %s626_s0, %s444_s11  ;;  %p448_p9 = scmp.lt.u32.totalorder %s444_s11, %s626_s0 }
  0x17   :  { %p450_p10 = pnand %p448_p9, %p445_p8 }
  0x19   :  { %453 = shalt.err (!%p450_p10)
}
  0x1a   :  { %s454_s16 = scalar_lea.vmem %s556_s21, 128  ;;  %p459_p12 = scmp.lt.s32.totalorder %s556_s21, %s556_s21 }
  0x1b   :  { %p455_p11 = scmp.ne.s32.totalorder %s556_s21, %s454_s16  ;;  %p460_p13 = scmp.lt.s32.totalorder %s454_s16, %s454_s16 }
  0x1d   :  { %p461_p0 = por %p460_p13, %p459_p12 }
  0x1f   :  { %p462_p1 = pnand %p461_p0, %p455_p11 }
  0x21   :  { %465 = shalt.err (!%p462_p1)
}
  0x22   :  { %24 = dma.hbm_to_vmem [thread:$0]  %s626_s0, 128, %s556_s21, [#allocation3], %s518_s30, %s518_s30, %s519_s6  }
  0x23   :  { %s520_s18 = smov [#allocation7]   ;;  %s466_s23 = scalar_lea.hbm %s629_s3, 1024 }
  0x24   :  { %s44_s19 = sshll.u32 %s520_s18, 4  ;;  %p467_p2 = scmp.ne.s32.totalorder %s629_s3, %s466_s23  ;;  %s45_s19 = int_to_ptr.vmem [resolvable:$true] %s44_s19 }
  0x25   :  { %p470_p3 = scmp.lt.u32.totalorder %s466_s23, %s629_s3 }
  0x27   :  { %p472_p4 = pnand %p470_p3, %p467_p2 }
  0x29   :  { %475 = shalt.err (!%p472_p4)
}
  0x2a   :  { %s476_s28 = scalar_lea.vmem %s45_s19, 1024  ;;  %p481_p6 = scmp.lt.s32.totalorder %s45_s19, %s45_s19 }
  0x2b   :  { %p477_p5 = scmp.ne.s32.totalorder %s45_s19, %s476_s28  ;;  %p482_p7 = scmp.lt.s32.totalorder %s476_s28, %s476_s28 }
  0x2d   :  { %p483_p8 = por %p482_p7, %p481_p6 }
  0x2f   :  { %p484_p9 = pnand %p483_p8, %p477_p5 }
  0x31   :  { %487 = shalt.err (!%p484_p9)
}
  0x32   :  { %50 = dma.hbm_to_vmem [thread:$0]  %s629_s3, 1024, %s45_s19, [#allocation6], %s518_s30, %s518_s30, %s519_s6  }
  0x33   :  { %510 = dma.done.wait [#allocation3], 128  }
  0x34   :  { %511 = vsyncadd [#allocation3], 4294967168 }
  0x35   :  { %512 = dma.done.wait [#allocation6], 2048  }
  0x36   :  { %513 = vsyncadd [#allocation6], 4294965248  ;;  %v521_v0 = vmov 0.0   ;;  %vm522_vm0 = vmmov 0   ;;  %v405_v1 = vld [vmem:[#allocation5] sm:$0xff]   ;;  %v406_v2 = vld [vmem:[#allocation5 + $0x8] sm:$0xff]  }
  0x37   :  { %355 = vmatprep.subr.bf16.mxu0 %v521_v0  ;;  %371 = vmatprep.mubr.msk.bf16.mxu0 %vm522_vm0, %v521_v0  ;;  %v407_v3 = vld [vmem:[#allocation5 + $0x10] sm:$0xff]   ;;  %v414_v4 = vld [vmem:[#allocation7] sm:$0xff]   ;;  %v408_v5 = vld [vmem:[#allocation5 + $0x18] sm:$0xff]   ;;  %s523_s7 = smov [#allocation8]  }
  0x38   :  { %375 = vmatprep.subr.bf16.mxu1 %v521_v0  ;;  %391 = vmatprep.mubr.msk.bf16.mxu1 %vm522_vm0, %v521_v0  ;;  %v415_v6 = vld [vmem:[#allocation7 + $0x8] sm:$0xff]   ;;  %v409_v7 = vld [vmem:[#allocation5 + $0x20] sm:$0xff]   ;;  %v416_v8 = vld [vmem:[#allocation7 + $0x10] sm:$0xff]   ;;  %s305_s8 = sshll.u32 %s523_s7, 4  ;;  %s306_s8 = int_to_ptr.vmem [resolvable:$true] %s305_s8 }
  0x39   :  { %356 = vmatpush3.bf16.msra.mxu0 %v405_v1  ;;  %376 = vmatpush3.bf16.msra.mxu1 %v414_v4  ;;  %v410_v9 = vld [vmem:[#allocation5 + $0x28] sm:$0xff]   ;;  %v417_v10 = vld [vmem:[#allocation7 + $0x18] sm:$0xff]   ;;  %v411_v11 = vld [vmem:[#allocation5 + $0x30] sm:$0xff]   ;;  %p493_p11 = scmp.lt.s32.totalorder %s306_s8, %s306_s8 }
  0x3a   :  { %357 = vmatprep.subr.bf16.mxu0 %v521_v0  ;;  %377 = vmatprep.subr.bf16.mxu1 %v521_v0  ;;  %v418_v12 = vld [vmem:[#allocation7 + $0x20] sm:$0xff]   ;;  %v412_v13 = vld [vmem:[#allocation5 + $0x38] sm:$0xff]   ;;  %v419_v14 = vld [vmem:[#allocation7 + $0x28] sm:$0xff]  }
  0x3b   :  { %v413_v15 = vld [vmem:[#allocation2] sm:$0xff]   ;;  %v420_v16 = vld [vmem:[#allocation7 + $0x30] sm:$0xff]  }
  0x3c   :  { %v421_v17 = vld [vmem:[#allocation7 + $0x38] sm:$0xff]  }
  0x3d   :  { %358 = vmatpush3.bf16.msra.mxu0 %v406_v2  ;;  %378 = vmatpush3.bf16.msra.mxu1 %v415_v6  ;;  %v318_v18 = vld [vmem:[%s628_s2] ss:$0 sm:$0xff]  ;;  %s488_s2 = scalar_lea.vmem %s306_s8, 256 }
  0x3e   :  { %359 = vmatprep.subr.bf16.mxu0 %v521_v0  ;;  %379 = vmatprep.subr.bf16.mxu1 %v521_v0  ;;  %v328_v28 = vld [vmem:[%s630_s4] ss:$0 sm:$0xff]  ;;  %p489_p10 = scmp.ne.s32.totalorder %s306_s8, %s488_s2  ;;  %p494_p12 = scmp.lt.s32.totalorder %s488_s2, %s488_s2 }
  0x40   :  { %p495_p13 = por %p494_p12, %p493_p11 }
  0x41   :  { %360 = vmatpush3.bf16.msra.mxu0 %v407_v3  ;;  %380 = vmatpush3.bf16.msra.mxu1 %v416_v8 }
  0x42   :  { %361 = vmatprep.subr.bf16.mxu0 %v521_v0  ;;  %381 = vmatprep.subr.bf16.mxu1 %v521_v0  ;;  %p496_p0 = pnand %p495_p13, %p489_p10 }
  0x45   :  { %362 = vmatpush3.bf16.msra.mxu0 %v408_v5  ;;  %382 = vmatpush3.bf16.msra.mxu1 %v417_v10 }
  0x46   :  { %363 = vmatprep.subr.bf16.mxu0 %v521_v0  ;;  %383 = vmatprep.subr.bf16.mxu1 %v521_v0 }
  0x49   :  { %364 = vmatpush3.bf16.msra.mxu0 %v409_v7  ;;  %384 = vmatpush3.bf16.msra.mxu1 %v418_v12 }
  0x4a   :  { %365 = vmatprep.subr.bf16.mxu0 %v521_v0  ;;  %385 = vmatprep.subr.bf16.mxu1 %v521_v0 }
  0x4d   :  { %366 = vmatpush3.bf16.msra.mxu0 %v410_v9  ;;  %386 = vmatpush3.bf16.msra.mxu1 %v419_v14 }
  0x4e   :  { %367 = vmatprep.subr.bf16.mxu0 %v521_v0  ;;  %387 = vmatprep.subr.bf16.mxu1 %v521_v0 }
  0x51   :  { %368 = vmatpush3.bf16.msra.mxu0 %v411_v11  ;;  %388 = vmatpush3.bf16.msra.mxu1 %v420_v16 }
  0x52   :  { %369 = vmatprep.subr.bf16.mxu0 %v521_v0  ;;  %389 = vmatprep.subr.bf16.mxu1 %v521_v0 }
  0x55   :  { %370 = vmatpush3.bf16.msra.mxu0 %v412_v13  ;;  %390 = vmatpush3.bf16.msra.mxu1 %v421_v17 }
  0x58   :  { %372 = vmatmul.mubr.bf16.vlgmr.msra.gmra.mrb[0].mxu0 %v413_v15 }
 0x12b   :  { %v176_v19 = vpop.f32.mrb[0].mxu0 }
 0x12c   :  { %v177_v20 = vadd.f32 %v318_v18, %v176_v19  ;;  %v373_v21 = vpop.f32.mrb[1].mxu0 }
 0x12d   :  { %v179_v22 = vpop.f32.mrb[2].mxu0 }
 0x12e   :  { %v180_v23 = vadd.f32 %v318_v18, %v179_v22  ;;  %v374_v24 = vpop.f32.mrb[3].mxu0  ;;  %v183_v25 = vmax.f32 %v177_v20, 0.0 }
 0x130   :  { %v184_v26 = vmax.f32 %v180_v23, 0.0 }
 0x132   :  { %v185_v27 = vpack.c.bf16 %v184_v26, %v183_v25 }
 0x134   :  { %392 = vmatmul.mubr.bf16.vlgmr.msra.gmra.mrb[0].mxu1 %v185_v27 }
 0x207   :  { %v291_v29 = vpop.f32.mrb[0].mxu1 }
 0x208   :  { %v292_v30 = vadd.f32 %v328_v28, %v291_v29  ;;  %v393_v31 = vpop.f32.mrb[1].mxu1 }
 0x209   :  { %v294_v32 = vpop.f32.mrb[2].mxu1 }
 0x20a   :  { %298 = vst [vmem:[#allocation8] sm:$0xff] %v292_v30  ;;  %v295_v33 = vadd.f32 %v328_v28, %v294_v32  ;;  %v394_v34 = vpop.f32.mrb[3].mxu1 }
 0x20c   :  { %299 = vst [vmem:[#allocation8 + $0x8] sm:$0xff] %v295_v33 }
 0x20d   :  { %499 = shalt.err (!%p496_p0)
}
 0x20e   :  { %s500_s10 = scalar_lea.hbm %s631_s5, 256 }
 0x20f   :  { %p501_p1 = scmp.ne.s32.totalorder %s631_s5, %s500_s10  ;;  %p504_p2 = scmp.lt.u32.totalorder %s500_s10, %s631_s5 }
 0x211   :  { %p506_p3 = pnand %p504_p2, %p501_p1 }
 0x213   :  { %509 = shalt.err (!%p506_p3)
}
 0x214   :  { %s524_s15 = smov 128   ;;  %s525_s16 = smov 8  }
 0x215   :  { %311 = dma.vmem_to_hbm [thread:$0]  %s306_s8, 256, %s631_s5, [#allocation4], %s524_s15, %s524_s15, %s525_s16  }
 0x216   :  { %514 = dma.done.wait [#allocation4], 256  }
 0x217   :  { %515 = vsyncadd [#allocation4], 4294967040 }
 0x218   :  { %315 = vsyncpa [#allocation3], 1 }
 0x219   :  { %316 = vsyncpa [#allocation6], 1 }
 0x21a   :  { %317 = vsyncpa [#allocation4], 1 }

</bundles_post_ra>
